<compile_context>
chip_gen: v6e
topology: v6e:2x2x1
jax: 0.10.0
libtpu: 0.0.40
codegen_flags: <defaults>
</compile_context>

<pallas_src>
import functools

import jax
import jax.numpy as jnp
from jax.experimental import pallas as pl
from jax.experimental.pallas import tpu as pltpu


def _round_up(v, m):
    return ((v + m - 1) // m) * m


def _cdiv(a, b):
    return (a + b - 1) // b


def _sigmoid(z):
    # Exact sigmoid via tanh: routed to the EUP slot, no exp(-z) overflow,
    # no approx-reciprocal error on the module's final output.
    return 0.5 * jnp.tanh(0.5 * z) + 0.5


def _autoencoder_kernel(x_ref, w1_ref, b1_ref, w2_ref, b2_ref, out_ref):
    # x_ref:  (tb, nq_p)   f32 (cast to MXU dtype in-kernel)
    # w1_ref: (nq_p, k_p)  b1_ref: (1, k_p)
    # w2_ref: (k_p, nq_p)  b2_ref: (1, nq_p)
    # out_ref:(tb, nq_p)
    x = x_ref[...].astype(w1_ref.dtype)          # in-kernel cast (no XLA copy)

    # h = sigmoid(x @ W1 + b1), f32 accumulation on the MXU.
    z1 = jnp.dot(x, w1_ref[...], preferred_element_type=jnp.float32)
    h = _sigmoid(z1 + b1_ref[...])               # broadcast (1, k_p)

    # out = sigmoid(h @ W2 + b2).
    z2 = jnp.dot(h.astype(w2_ref.dtype), w2_ref[...],
                 preferred_element_type=jnp.float32)
    out_ref[...] = _sigmoid(z2 + b2_ref[...]).astype(out_ref.dtype)


def prepare_params(w1, b1, w2, b2, *, matmul_dtype=jnp.bfloat16):
    """Pad k / num_question up to multiples of 128 and cast weights ONCE.

    Call this at init time; the padded/cast params are reused by every
    forward call (no per-call weight re-padding traffic).  bf16 operands are
    the right default on v5e/v6e/v7x alike (accumulation stays f32).
    """
    nq, k = w1.shape
    nq_p, k_p = _round_up(nq, 128), _round_up(k, 128)
    w1p = jnp.zeros((nq_p, k_p), matmul_dtype).at[:nq, :k].set(
        w1.astype(matmul_dtype))
    b1p = jnp.zeros((1, k_p), jnp.float32).at[0, :k].set(b1.astype(jnp.float32))
    w2p = jnp.zeros((k_p, nq_p), matmul_dtype).at[:k, :nq].set(
        w2.astype(matmul_dtype))
    b2p = jnp.zeros((1, nq_p), jnp.float32).at[0, :nq].set(b2.astype(jnp.float32))
    return (w1p, b1p, w2p, b2p)


@functools.partial(jax.jit, static_argnames=("tb", "out_dtype"))
def autoencoder_forward(x, params, *, tb=512, out_dtype=jnp.float32):
    """x: (B, num_question) f32.  params: output of prepare_params().

    tb: max batch tile (512 default; 1024 is fine for very large B).
    out_dtype: jnp.float32 (exact) or jnp.bfloat16 (halves output HBM traffic).
    """
    w1p, b1p, w2p, b2p = params
    B_in, nq = x.shape
    nq_p, k_p = w1p.shape

    # Fallback only: pad the feature dim if num_question isn't 128-aligned.
    if nq_p != nq:
        x = jnp.zeros((x.shape[0], nq_p), x.dtype).at[:, :nq].set(x)
    # Fallback only: tiny batches padded up to one sublane-aligned tile.
    B = B_in
    if B < 8:
        x = jnp.zeros((8, nq_p), x.dtype).at[:B].set(x)
        B = 8

    # Balanced batch tiles; ensure >= 2 grid steps when B >= 16 so the
    # "parallel" batch axis uses both TensorCores on v7x. The last tile may be
    # partial: OOB rows are never written back.
    n_tiles = 1 if B < 16 else max(2, _cdiv(B, tb))
    tb_eff = _round_up(_cdiv(B, n_tiles), 8)
    grid_b = _cdiv(B, tb_eff)

    xb = jnp.dtype(x.dtype).itemsize
    mb = jnp.dtype(w1p.dtype).itemsize
    ob = jnp.dtype(out_dtype).itemsize
    est = (2 * tb_eff * nq_p * xb                 # x tiles (double buffered)
           + 2 * tb_eff * nq_p * ob               # out tiles (double buffered)
           + (nq_p * k_p + k_p * nq_p) * mb       # W1, W2 (resident)
           + (k_p + nq_p) * 4                     # biases
           + 4 * tb_eff * max(nq_p, k_p) * 4)     # f32 intermediates headroom
    # v7x has 64 MiB physical VMEM -> cap well below it; modest 8 MiB floor.
    vmem_limit = int(min(48 * 2**20, max(8 * 2**20, 2 * est)))

    out = pl.pallas_call(
        _autoencoder_kernel,
        out_shape=jax.ShapeDtypeStruct((B, nq_p), out_dtype),
        grid_spec=pltpu.PrefetchScalarGridSpec(
            num_scalar_prefetch=0,
            grid=(grid_b,),
            in_specs=[
                pl.BlockSpec((tb_eff, nq_p), lambda i: (i, 0)),  # x tile
                pl.BlockSpec((nq_p, k_p), lambda i: (0, 0)),     # W1 resident
                pl.BlockSpec((1, k_p), lambda i: (0, 0)),        # b1 resident
                pl.BlockSpec((k_p, nq_p), lambda i: (0, 0)),     # W2 resident
                pl.BlockSpec((1, nq_p), lambda i: (0, 0)),       # b2 resident
            ],
            out_specs=pl.BlockSpec((tb_eff, nq_p), lambda i: (i, 0)),
        ),
        compiler_params=pltpu.CompilerParams(
            dimension_semantics=("parallel",),    # batch axis -> both TCs (v7x)
            vmem_limit_bytes=vmem_limit,
        ),
    )(x, w1p, b1p, w2p, b2p)

    # Only the (rare) fallback paths need slicing; the fast path returns as-is.
    if B != B_in:
        out = out[:B_in]
    if nq_p != nq:
        out = out[:, :nq]
    return out


def init_autoencoder_params(key, num_question, k=100, dtype=jnp.float32):
    """Deterministic init matching nn.Linear's U(-1/sqrt(in), 1/sqrt(in))."""
    k1, k2, k3, k4 = jax.random.split(key, 4)
    bound_g = 1.0 / jnp.sqrt(jnp.float32(num_question))
    bound_h = 1.0 / jnp.sqrt(jnp.float32(k))
    # Stored pre-transposed: (in_features, out_features).
    w1 = jax.random.uniform(k1, (num_question, k), dtype, -bound_g, bound_g)
    b1 = jax.random.uniform(k2, (k,), dtype, -bound_g, bound_g)
    w2 = jax.random.uniform(k3, (k, num_question), dtype, -bound_h, bound_h)
    b2 = jax.random.uniform(k4, (num_question,), dtype, -bound_h, bound_h)
    return w1, b1, w2, b2


def reference_forward(x, w1, b1, w2, b2):
    h = jax.nn.sigmoid(x @ w1 + b1)
    return jax.nn.sigmoid(h @ w2 + b2)


if __name__ == "__main__":
    key = jax.random.PRNGKey(0)
    kx, kp = jax.random.split(key)

    num_question = 256  # 128-aligned: x flows into pallas_call with zero copies
    k = 100             # module default hidden size

    w1, b1, w2, b2 = init_autoencoder_params(kp, num_question, k)

    # Padding / casting of the weights happens once, outside the hot path.
    params_bf16 = prepare_params(w1, b1, w2, b2, matmul_dtype=jnp.bfloat16)
    params_f32 = prepare_params(w1, b1, w2, b2, matmul_dtype=jnp.float32)

    # 1) Small batch, single tile, f32 MXU path (tight check).
    x_small = jax.random.uniform(kx, (8, num_question), jnp.float32)
    ref_small = reference_forward(x_small, w1, b1, w2, b2)
    out_f32 = jax.block_until_ready(autoencoder_forward(x_small, params_f32))
    assert out_f32.shape == (8, num_question)
    assert jnp.allclose(out_f32, ref_small, atol=1e-2), \
        float(jnp.max(jnp.abs(out_f32 - ref_small)))

    # 2) Small batch, default bf16 MXU path.
    out_bf16 = jax.block_until_ready(autoencoder_forward(x_small, params_bf16))
    assert out_bf16.shape == (8, num_question)
    assert jnp.allclose(out_bf16, ref_small, atol=3e-2), \
        float(jnp.max(jnp.abs(out_bf16 - ref_small)))

    # 3) Ragged batch: two grid steps with a masked partial last tile.
    x_rag = jax.random.uniform(kx, (100, num_question), jnp.float32)
    ref_rag = reference_forward(x_rag, w1, b1, w2, b2)
    out_rag = jax.block_until_ready(autoencoder_forward(x_rag, params_f32))
    assert out_rag.shape == (100, num_question)
    assert jnp.allclose(out_rag, ref_rag, atol=1e-2), \
        float(jnp.max(jnp.abs(out_rag - ref_rag)))

    # 4) Larger batch: two balanced 192-row tiles (no padded rows) + bf16 out.
    x_big = jax.random.uniform(kx, (384, num_question), jnp.float32)
    ref_big = reference_forward(x_big, w1, b1, w2, b2)
    out_big = jax.block_until_ready(
        autoencoder_forward(x_big, params_bf16, out_dtype=jnp.bfloat16))
    assert out_big.shape == (384, num_question)
    assert jnp.allclose(out_big.astype(jnp.float32), ref_big, atol=3e-2), \
        float(jnp.max(jnp.abs(out_big.astype(jnp.float32) - ref_big)))

    print("KERNEL_OK")
</pallas_src>

<mosaic_0001>
module attributes {stable_mosaic.version = 11 : i64} {
  func.func @_autoencoder_kernel(%arg0: i32, %arg1: memref<8x256xf32, #tpu.memory_space<vmem>>, %arg2: memref<256x128xf32, #tpu.memory_space<vmem>>, %arg3: memref<1x128xf32, #tpu.memory_space<vmem>>, %arg4: memref<128x256xf32, #tpu.memory_space<vmem>>, %arg5: memref<1x256xf32, #tpu.memory_space<vmem>>, %arg6: memref<8x256xf32, #tpu.memory_space<vmem>>) attributes {dimension_semantics = [#tpu.dimension_semantics<parallel>], iteration_bounds = array<i64: 1>, scalar_prefetch = 0 : i64, scratch_operands = 0 : i64, tpu.core_type = #tpu.core_type<tc>, window_params = [{transform_indices = @transform_0, window_bounds = array<i64: 8, 256>}, {pipeline_mode = #tpu.pipeline_mode<synchronous>, transform_indices = @transform_1, window_bounds = array<i64: 256, 128>}, {pipeline_mode = #tpu.pipeline_mode<synchronous>, transform_indices = @transform_2, window_bounds = array<i64: 1, 128>}, {pipeline_mode = #tpu.pipeline_mode<synchronous>, transform_indices = @transform_3, window_bounds = array<i64: 128, 256>}, {pipeline_mode = #tpu.pipeline_mode<synchronous>, transform_indices = @transform_4, window_bounds = array<i64: 1, 256>}, {transform_indices = @transform_5, window_bounds = array<i64: 8, 256>}]} {
    %c0 = arith.constant 0 : index
    %c0_0 = arith.constant 0 : index
    %0 = vector.load %arg1[%c0, %c0_0] : memref<8x256xf32, #tpu.memory_space<vmem>>, vector<8x256xf32>
    %c0_1 = arith.constant 0 : index
    %c0_2 = arith.constant 0 : index
    %1 = vector.load %arg2[%c0_1, %c0_2] : memref<256x128xf32, #tpu.memory_space<vmem>>, vector<256x128xf32>
    %cst = arith.constant dense<0.000000e+00> : vector<8x128xf32>
    %2 = tpu.matmul %0, %1, %cst {dimension_numbers = #tpu.dot_dimension_numbers<[1], [0], [0], [1], [0, 0, 1, 1], [], []>} : vector<8x256xf32>, vector<256x128xf32>, vector<8x128xf32> -> vector<8x128xf32>
    %c0_3 = arith.constant 0 : index
    %c0_4 = arith.constant 0 : index
    %3 = vector.load %arg3[%c0_3, %c0_4] : memref<1x128xf32, #tpu.memory_space<vmem>>, vector<1x128xf32>
    %4 = vector.broadcast %3 : vector<1x128xf32> to vector<8x128xf32>
    %5 = arith.addf %2, %4 : vector<8x128xf32>
    %cst_5 = arith.constant 5.000000e-01 : f32
    %6 = vector.broadcast %cst_5 : f32 to vector<8x128xf32>
    %7 = arith.mulf %6, %5 : vector<8x128xf32>
    %8 = math.tanh %7 : vector<8x128xf32>
    %cst_6 = arith.constant 5.000000e-01 : f32
    %9 = vector.broadcast %cst_6 : f32 to vector<8x128xf32>
    %10 = arith.mulf %9, %8 : vector<8x128xf32>
    %cst_7 = arith.constant 5.000000e-01 : f32
    %11 = vector.broadcast %cst_7 : f32 to vector<8x128xf32>
    %12 = arith.addf %10, %11 : vector<8x128xf32>
    %c0_8 = arith.constant 0 : index
    %c0_9 = arith.constant 0 : index
    %13 = vector.load %arg4[%c0_8, %c0_9] : memref<128x256xf32, #tpu.memory_space<vmem>>, vector<128x256xf32>
    %cst_10 = arith.constant dense<0.000000e+00> : vector<8x256xf32>
    %14 = tpu.matmul %12, %13, %cst_10 {dimension_numbers = #tpu.dot_dimension_numbers<[1], [0], [0], [1], [0, 0, 1, 1], [], []>} : vector<8x128xf32>, vector<128x256xf32>, vector<8x256xf32> -> vector<8x256xf32>
    %c0_11 = arith.constant 0 : index
    %c0_12 = arith.constant 0 : index
    %15 = vector.load %arg5[%c0_11, %c0_12] : memref<1x256xf32, #tpu.memory_space<vmem>>, vector<1x256xf32>
    %16 = vector.broadcast %15 : vector<1x256xf32> to vector<8x256xf32>
    %17 = arith.addf %14, %16 : vector<8x256xf32>
    %cst_13 = arith.constant 5.000000e-01 : f32
    %18 = vector.broadcast %cst_13 : f32 to vector<8x256xf32>
    %19 = arith.mulf %18, %17 : vector<8x256xf32>
    %20 = math.tanh %19 : vector<8x256xf32>
    %cst_14 = arith.constant 5.000000e-01 : f32
    %21 = vector.broadcast %cst_14 : f32 to vector<8x256xf32>
    %22 = arith.mulf %21, %20 : vector<8x256xf32>
    %cst_15 = arith.constant 5.000000e-01 : f32
    %23 = vector.broadcast %cst_15 : f32 to vector<8x256xf32>
    %24 = arith.addf %22, %23 : vector<8x256xf32>
    %c0_16 = arith.constant 0 : index
    %c0_17 = arith.constant 0 : index
    %25 = vector.load %arg6[%c0_16, %c0_17] : memref<8x256xf32, #tpu.memory_space<vmem>>, vector<8x256xf32>
    tpu.vector_store %arg6[%c0_16, %c0_17], %24 {strides = array<i32>} : memref<8x256xf32, #tpu.memory_space<vmem>>, vector<8x256xf32>,
    return
  }
  func.func @transform_0(%arg0: i32) -> (i32, i32) {
    %c0_i32 = arith.constant 0 : i32
    %c0_i32_0 = arith.constant 0 : i32
    return %arg0, %c0_i32 : i32, i32
  }
  func.func @transform_1(%arg0: i32) -> (i32, i32) {
    %c0_i32 = arith.constant 0 : i32
    %c0_i32_0 = arith.constant 0 : i32
    %c0_i32_1 = arith.constant 0 : i32
    return %c0_i32, %c0_i32_0 : i32, i32
  }
  func.func @transform_2(%arg0: i32) -> (i32, i32) {
    %c0_i32 = arith.constant 0 : i32
    %c0_i32_0 = arith.constant 0 : i32
    %c0_i32_1 = arith.constant 0 : i32
    return %c0_i32, %c0_i32_0 : i32, i32
  }
  func.func @transform_3(%arg0: i32) -> (i32, i32) {
    %c0_i32 = arith.constant 0 : i32
    %c0_i32_0 = arith.constant 0 : i32
    %c0_i32_1 = arith.constant 0 : i32
    return %c0_i32, %c0_i32_0 : i32, i32
  }
  func.func @transform_4(%arg0: i32) -> (i32, i32) {
    %c0_i32 = arith.constant 0 : i32
    %c0_i32_0 = arith.constant 0 : i32
    %c0_i32_1 = arith.constant 0 : i32
    return %c0_i32, %c0_i32_0 : i32, i32
  }
  func.func @transform_5(%arg0: i32) -> (i32, i32) {
    %c0_i32 = arith.constant 0 : i32
    %c0_i32_0 = arith.constant 0 : i32
    return %arg0, %c0_i32 : i32, i32
  }
}

</mosaic_0001>

<bundles_post_ra>
// kernel: autoencoder_forward.1
= control target key start
LH: loop header
LB: loop body
LE: loop exit
PB: predicated region body
PF: predicated region fallthrough
CT: control target
= control target key end

     0   :  { %10 = vsyncpa [#allocation3], 0  ;;  %s510_s0 = inlined_call_operand.hbm [shape: f32[8,256], index: 0, kind: input, shape index: {}]   ;;  %s511_s1 = inlined_call_operand.hbm [shape: f32[256,128], index: 1, kind: input, shape index: {}]   ;;  %s512_s2 = inlined_call_operand.vmem [shape: f32[1,128], index: 2, kind: input, shape index: {}]   ;;  %s513_s3 = inlined_call_operand.hbm [shape: f32[128,256], index: 3, kind: input, shape index: {}]   ;;  %s514_s4 = inlined_call_operand.vmem [shape: f32[1,256], index: 4, kind: input, shape index: {}]   ;;  %s515_s5 = inlined_call_operand.hbm [shape: f32[8,256], index: 5, kind: output, shape index: {}]  }
   0x1   :  { %11 = vsyncpa [#allocation6], 0 }
   0x2   :  { %12 = vsyncpa [#allocation4], 0  ;;  %s453_s18 = smov [#allocation5]  }
   0x3   :  { %s28_s19 = sshll.u32 %s453_s18, 4  ;;  %s29_s19 = int_to_ptr.vmem [resolvable:$true] %s28_s19 }
   0x4   :  { %s375_s20 = scalar_lea.vmem %s29_s19, 4096  ;;  %p380_p1 = scmp.lt.s32.totalorder %s29_s19, %s29_s19 }
   0x5   :  { %p376_p0 = scmp.ne.s32.totalorder %s29_s19, %s375_s20  ;;  %p381_p2 = scmp.lt.s32.totalorder %s375_s20, %s375_s20 }
   0x7   :  { %p382_p3 = por %p381_p2, %p380_p1 }
   0x9   :  { %p383_p4 = pnand %p382_p3, %p376_p0 }
   0xb   :  { %386 = shalt.err (!%p383_p4)
}
   0xc   :  { %s454_s21 = smov 128   ;;  %s455_s22 = smov 8  }
   0xd   :  { %34 = dma.hbm_to_vmem [thread:$0]  %s511_s1, 4096, %s29_s19, [#allocation6], %s454_s21, %s454_s21, %s455_s22  }
   0xe   :  { %s456_s25 = smov [#allocation2]   ;;  %s457_s27 = smov [#allocation7]  }
   0xf   :  { %s19_s26 = sshll.u32 %s456_s25, 4  ;;  %s42_s28 = sshll.u32 %s457_s27, 4  ;;  %s20_s26 = int_to_ptr.vmem [resolvable:$true] %s19_s26  ;;  %s43_s28 = int_to_ptr.vmem [resolvable:$true] %s42_s28 }
  0x10   :  { %s395_s29 = scalar_lea.vmem %s20_s26, 256  ;;  %p400_p6 = scmp.lt.s32.totalorder %s20_s26, %s20_s26 }
  0x11   :  { %p396_p5 = scmp.ne.s32.totalorder %s20_s26, %s395_s29  ;;  %p401_p7 = scmp.lt.s32.totalorder %s395_s29, %s395_s29 }
  0x13   :  { %p402_p8 = por %p401_p7, %p400_p6 }
  0x15   :  { %p403_p9 = pnand %p402_p8, %p396_p5 }
  0x17   :  { %406 = shalt.err (!%p403_p9)
}
  0x18   :  { %22 = dma.hbm_to_vmem [thread:$0]  %s510_s0, 256, %s20_s26, [#allocation3]  }
  0x19   :  { %s415_s7 = scalar_lea.vmem %s43_s28, 4096  ;;  %p420_p11 = scmp.lt.s32.totalorder %s43_s28, %s43_s28 }
  0x1a   :  { %p416_p10 = scmp.ne.s32.totalorder %s43_s28, %s415_s7  ;;  %p421_p12 = scmp.lt.s32.totalorder %s415_s7, %s415_s7 }
  0x1c   :  { %p422_p13 = por %p421_p12, %p420_p11 }
  0x1e   :  { %p423_p0 = pnand %p422_p13, %p416_p10 }
  0x20   :  { %426 = shalt.err (!%p423_p0)
}
  0x21   :  { %s458_s1 = smov 256   ;;  %s459_s8 = smov 16  }
  0x22   :  { %48 = dma.hbm_to_vmem [thread:$0]  %s513_s3, 4096, %s43_s28, [#allocation6], %s458_s1, %s458_s1, %s459_s8  }
  0x23   :  { %447 = dma.done.wait [#allocation3], 256  }
  0x24   :  { %448 = vsyncadd [#allocation3], 4294967040 }
  0x25   :  { %449 = dma.done.wait [#allocation6], 8192  }
  0x26   :  { %450 = vsyncadd [#allocation6], 4294959104  ;;  %v93_v0 = vld [vmem:[#allocation5 + $0xf8] sm:$0xff]  ;;  %v92_v2 = vld [vmem:[#allocation5 + $0xf0] sm:$0xff]  ;;  %v460_v53 = vmov 0.0  }
  0x27   :  { %v77_v1 = vld [vmem:[#allocation5 + $0x78] sm:$0xff]  ;;  %317 = vmatprep.subr.mxu0 %v93_v0  ;;  %v76_v3 = vld [vmem:[#allocation5 + $0x70] sm:$0xff]  ;;  %v91_v4 = vld [vmem:[#allocation5 + $0xe8] sm:$0xff]  ;;  %283 = vmatprep.mubr.f32.mxu1 %v460_v53 }
  0x28   :  { %318 = vmatpush3.msra.mxu0 %v77_v1  ;;  %v75_v5 = vld [vmem:[#allocation5 + $0x68] sm:$0xff]  ;;  %v90_v6 = vld [vmem:[#allocation5 + $0xe0] sm:$0xff]  ;;  %v89_v8 = vld [vmem:[#allocation5 + $0xd8] sm:$0xff] }
  0x29   :  { %319 = vmatprep.subr.mxu0 %v92_v2  ;;  %v74_v7 = vld [vmem:[#allocation5 + $0x60] sm:$0xff]  ;;  %v73_v9 = vld [vmem:[#allocation5 + $0x58] sm:$0xff]  ;;  %v88_v10 = vld [vmem:[#allocation5 + $0xd0] sm:$0xff] }
  0x2a   :  { %320 = vmatpush3.msra.mxu0 %v76_v3  ;;  %v72_v11 = vld [vmem:[#allocation5 + $0x50] sm:$0xff]  ;;  %v87_v12 = vld [vmem:[#allocation5 + $0xc8] sm:$0xff]  ;;  %v61_v13 = vld [vmem:[#allocation2 + $0x8] sm:$0xff] }
  0x2b   :  { %321 = vmatprep.subr.mxu0 %v91_v4  ;;  %v71_v14 = vld [vmem:[#allocation5 + $0x48] sm:$0xff]  ;;  %165 = vmatprep.mubr.f32.mxu0 %v61_v13  ;;  %v206_v15 = vld [vmem:[#allocation7 + $0xf8] sm:$0xff]  ;;  %v205_v16 = vld [vmem:[#allocation7 + $0xf0] sm:$0xff] }
  0x2c   :  { %322 = vmatpush3.msra.mxu0 %v75_v5  ;;  %v86_v17 = vld [vmem:[#allocation5 + $0xc0] sm:$0xff]  ;;  %219 = vmatprep.subr.mxu1 %v206_v15  ;;  %v204_v18 = vld [vmem:[#allocation7 + $0xe8] sm:$0xff]  ;;  %v202_v21 = vld [vmem:[#allocation7 + $0xd8] sm:$0xff] }
  0x2d   :  { %323 = vmatprep.subr.mxu0 %v90_v6  ;;  %v203_v19 = vld [vmem:[#allocation7 + $0xe0] sm:$0xff]  ;;  %220 = vmatpush1.msra.mxu1 %v205_v16  ;;  %v85_v22 = vld [vmem:[#allocation5 + $0xb8] sm:$0xff]  ;;  %v84_v24 = vld [vmem:[#allocation5 + $0xb0] sm:$0xff] }
  0x2e   :  { %324 = vmatpush3.msra.mxu0 %v74_v7  ;;  %v70_v20 = vld [vmem:[#allocation5 + $0x40] sm:$0xff]  ;;  %221 = vmatprep.subr.mxu1 %v204_v18  ;;  %v69_v23 = vld [vmem:[#allocation5 + $0x38] sm:$0xff]  ;;  %v68_v25 = vld [vmem:[#allocation5 + $0x30] sm:$0xff] }
  0x2f   :  { %325 = vmatprep.subr.mxu0 %v89_v8  ;;  %222 = vmatpush1.msra.mxu1 %v203_v19  ;;  %v83_v26 = vld [vmem:[#allocation5 + $0xa8] sm:$0xff]  ;;  %v82_v28 = vld [vmem:[#allocation5 + $0xa0] sm:$0xff]  ;;  %v81_v30 = vld [vmem:[#allocation5 + $0x98] sm:$0xff] }
  0x30   :  { %326 = vmatpush3.msra.mxu0 %v73_v9  ;;  %223 = vmatprep.subr.mxu1 %v202_v21  ;;  %v67_v27 = vld [vmem:[#allocation5 + $0x28] sm:$0xff]  ;;  %v66_v29 = vld [vmem:[#allocation5 + $0x20] sm:$0xff]  ;;  %v65_v31 = vld [vmem:[#allocation5 + $0x18] sm:$0xff] }
  0x31   :  { %327 = vmatprep.subr.mxu0 %v88_v10  ;;  %v80_v32 = vld [vmem:[#allocation5 + $0x90] sm:$0xff]  ;;  %v79_v34 = vld [vmem:[#allocation5 + $0x88] sm:$0xff]  ;;  %v78_v36 = vld [vmem:[#allocation5 + $0x80] sm:$0xff] }
  0x32   :  { %328 = vmatpush3.msra.mxu0 %v72_v11  ;;  %v64_v33 = vld [vmem:[#allocation5 + $0x10] sm:$0xff]  ;;  %v63_v35 = vld [vmem:[#allocation5 + $0x8] sm:$0xff]  ;;  %v62_v37 = vld [vmem:[#allocation5] sm:$0xff] }
  0x33   :  { %329 = vmatprep.subr.mxu0 %v87_v12  ;;  %v60_v38 = vld [vmem:[#allocation2] sm:$0xff]  ;;  %v200_v40 = vld [vmem:[#allocation7 + $0xc8] sm:$0xff]  ;;  %v199_v41 = vld [vmem:[#allocation7 + $0xc0] sm:$0xff]  ;;  %v209_v12 = vlaneseq }
  0x34   :  { %330 = vmatpush3.msra.mxu0 %v71_v14  ;;  %v201_v39 = vld [vmem:[#allocation7 + $0xd0] sm:$0xff]  ;;  %v198_v42 = vld [vmem:[#allocation7 + $0xb8] sm:$0xff]  ;;  %v196_v44 = vld [vmem:[#allocation7 + $0xa8] sm:$0xff] }
  0x35   :  { %331 = vmatprep.subr.mxu0 %v86_v17  ;;  %224 = vmatpush1.msra.mxu1 %v201_v39  ;;  %v197_v43 = vld [vmem:[#allocation7 + $0xb0] sm:$0xff]  ;;  %v195_v45 = vld [vmem:[#allocation7 + $0xa0] sm:$0xff]  ;;  %v194_v46 = vld [vmem:[#allocation7 + $0x98] sm:$0xff]  ;;  %v210_v13 = vshrl.u32 %v209_v12, 7 }
  0x36   :  { %332 = vmatpush3.msra.mxu0 %v70_v20  ;;  %225 = vmatprep.subr.mxu1 %v200_v40  ;;  %v193_v47 = vld [vmem:[#allocation7 + $0x90] sm:$0xff]  ;;  %v192_v48 = vld [vmem:[#allocation7 + $0x88] sm:$0xff]  ;;  %v191_v49 = vld [vmem:[#allocation7 + $0x80] sm:$0xff] }
  0x37   :  { %333 = vmatprep.subr.mxu0 %v85_v22  ;;  %226 = vmatpush1.msra.mxu1 %v199_v41  ;;  %v190_v50 = vld [vmem:[#allocation7 + $0x78] sm:$0xff]  ;;  %v189_v51 = vld [vmem:[#allocation7 + $0x70] sm:$0xff]  ;;  %v188_v52 = vld [vmem:[#allocation7 + $0x68] sm:$0xff]  ;;  %v211_v14 = vsub.s32 0, %v210_v13  ;;  %v215_v16 = vsub.s32 1, %v210_v13 }
  0x38   :  { %334 = vmatpush3.msra.mxu0 %v69_v23  ;;  %227 = vmatprep.subr.mxu1 %v198_v42  ;;  %v187_v54 = vld [vmem:[#allocation7 + $0x60] sm:$0xff]  ;;  %v186_v55 = vld [vmem:[#allocation7 + $0x58] sm:$0xff]  ;;  %v185_v56 = vld [vmem:[#allocation7 + $0x50] sm:$0xff] }
  0x39   :  { %335 = vmatprep.subr.mxu0 %v84_v24  ;;  %228 = vmatpush1.msra.mxu1 %v197_v43  ;;  %v184_v57 = vld [vmem:[#allocation7 + $0x48] sm:$0xff]  ;;  %v183_v58 = vld [vmem:[#allocation7 + $0x40] sm:$0xff]  ;;  %v182_v59 = vld [vmem:[#allocation7 + $0x38] sm:$0xff] }
  0x3a   :  { %336 = vmatpush3.msra.mxu0 %v68_v25  ;;  %229 = vmatprep.subr.mxu1 %v196_v44  ;;  %v181_v60 = vld [vmem:[#allocation7 + $0x30] sm:$0xff]  ;;  %v180_v61 = vld [vmem:[#allocation7 + $0x28] sm:$0xff]  ;;  %v179_v62 = vld [vmem:[#allocation7 + $0x20] sm:$0xff] }
  0x3b   :  { %337 = vmatprep.subr.mxu0 %v83_v26  ;;  %230 = vmatpush1.msra.mxu1 %v195_v45  ;;  %v178_v63 = vld [vmem:[#allocation7 + $0x18] sm:$0xff]  ;;  %v177_v0 = vld [vmem:[#allocation7 + $0x10] sm:$0xff]  ;;  %v176_v1 = vld [vmem:[#allocation7 + $0x8] sm:$0xff] }
  0x3c   :  { %338 = vmatpush3.msra.mxu0 %v67_v27  ;;  %231 = vmatprep.subr.mxu1 %v194_v46  ;;  %v175_v2 = vld [vmem:[#allocation7] sm:$0xff]  ;;  %v316_v4 = vld [vmem:[%s512_s2] ss:$0 sm:$0xff]  ;;  %s461_s2 = smov [#allocation8]  }
  0x3d   :  { %339 = vmatprep.subr.mxu0 %v82_v28  ;;  %232 = vmatpush1.msra.mxu1 %v193_v47  ;;  %v207_v15 = vld [vmem:[%s514_s4] sm:$0x3]  ;;  %s306_s13 = sshll.u32 %s461_s2, 4  ;;  %s307_s13 = int_to_ptr.vmem [resolvable:$true] %s306_s13 }
  0x3e   :  { %340 = vmatpush3.msra.mxu0 %v66_v29  ;;  %233 = vmatprep.subr.mxu1 %v192_v48  ;;  %v212_v17 = vrot.slane %v207_v15, %v211_v14  ;;  %v216_v18 = vrot.slane %v207_v15, %v215_v16  ;;  %s427_s4 = scalar_lea.vmem %s307_s13, 256  ;;  %p432_p2 = scmp.lt.s32.totalorder %s307_s13, %s307_s13 }
  0x3f   :  { %341 = vmatprep.subr.mxu0 %v81_v30  ;;  %234 = vmatpush1.msra.mxu1 %v191_v49  ;;  %p428_p1 = scmp.ne.s32.totalorder %s307_s13, %s427_s4  ;;  %p433_p3 = scmp.lt.s32.totalorder %s427_s4, %s427_s4 }
  0x40   :  { %342 = vmatpush3.msra.mxu0 %v65_v31  ;;  %235 = vmatprep.subr.mxu1 %v190_v50 }
  0x41   :  { %343 = vmatprep.subr.mxu0 %v80_v32  ;;  %236 = vmatpush1.msra.mxu1 %v189_v51  ;;  %p434_p4 = por %p433_p3, %p432_p2 }
  0x42   :  { %344 = vmatpush3.msra.mxu0 %v64_v33  ;;  %237 = vmatprep.subr.mxu1 %v188_v52 }
  0x43   :  { %345 = vmatprep.subr.mxu0 %v79_v34  ;;  %238 = vmatpush1.msra.mxu1 %v187_v54  ;;  %p435_p5 = pnand %p434_p4, %p428_p1 }
  0x44   :  { %346 = vmatpush3.msra.mxu0 %v63_v35  ;;  %239 = vmatprep.subr.mxu1 %v186_v55 }
  0x45   :  { %347 = vmatprep.subr.mxu0 %v78_v36  ;;  %240 = vmatpush1.msra.mxu1 %v185_v56 }
  0x46   :  { %348 = vmatpush3.msra.mxu0 %v62_v37  ;;  %241 = vmatprep.subr.mxu1 %v184_v57 }
  0x47   :  { %166 = vmatmul.mubr.f32.vlgmr.msra.gmra.mxu0 %v60_v38  ;;  %242 = vmatpush1.msra.mxu1 %v183_v58 }
  0x48   :  { %243 = vmatprep.subr.mxu1 %v182_v59 }
  0x49   :  { %244 = vmatpush1.msra.mxu1 %v181_v60 }
  0x4a   :  { %245 = vmatprep.subr.mxu1 %v180_v61 }
  0x4b   :  { %246 = vmatpush1.msra.mxu1 %v179_v62 }
  0x4c   :  { %247 = vmatprep.subr.mxu1 %v178_v63 }
  0x4d   :  { %248 = vmatpush1.msra.mxu1 %v177_v0 }
  0x4e   :  { %249 = vmatprep.subr.mxu1 %v176_v1 }
  0x4f   :  { %250 = vmatpush1.msra.mxu1 %v175_v2 }
 0x107   :  { %v349_v3 = vpop.f32.mrf.mxu0 }
 0x109   :  { %v350_v5 = vpop.f32.mrf.mxu0 }
 0x10a   :  { %v351_v6 = vadd.f32 %v350_v5, %v349_v3 }
 0x10c   :  { %v168_v7 = vadd.f32 %v351_v6, %v316_v4 }
 0x10e   :  { %v171_v8 = vmul.f32 0.5, %v168_v7 }
 0x110   :  { %361 = vtanh.f32 %v171_v8 }
 0x11d   :  { %v362_v9 = vpop.eup %361 }
 0x11e   :  { %v173_v10 = vmul.f32 0.5, %v362_v9 }
 0x120   :  { %v174_v11 = vadd.f32 0.5, %v173_v10 }
 0x122   :  { %284 = vmatmul.mubr.f32.vlgmr.msra.gmra.mxu1 %v174_v11 }
 0x1e2   :  { %v285_v19 = vpop.f32.mrf.mxu1 }
 0x1e3   :  { %v286_v20 = vadd.f32 %v285_v19, %v212_v17 }
 0x1e4   :  { %v287_v21 = vpop.f32.mrf.mxu1 }
 0x1e5   :  { %v290_v22 = vmul.f32 0.5, %v286_v20  ;;  %v288_v23 = vadd.f32 %v287_v21, %v216_v18 }
 0x1e7   :  { %363 = vtanh.f32 %v290_v22  ;;  %v291_v24 = vmul.f32 0.5, %v288_v23 }
 0x1e9   :  { %365 = vtanh.f32 %v291_v24 }
 0x1f4   :  { %v364_v25 = vpop.eup %363 }
 0x1f5   :  { %v294_v26 = vmul.f32 0.5, %v364_v25 }
 0x1f6   :  { %v366_v27 = vpop.eup %365 }
 0x1f7   :  { %v295_v28 = vmul.f32 0.5, %v366_v27  ;;  %v296_v29 = vadd.f32 0.5, %v294_v26 }
 0x1f9   :  { %v297_v30 = vadd.f32 0.5, %v295_v28  ;;  %298 = vst [vmem:[#allocation8] sm:$0xff] %v296_v29 }
 0x1fb   :  { %299 = vst [vmem:[#allocation8 + $0x8] sm:$0xff] %v297_v30 }
 0x1fc   :  { %438 = shalt.err (!%p435_p5)
}
 0x1fd   :  { %309 = dma.vmem_to_hbm [thread:$0]  %s307_s13, 256, %s515_s5, [#allocation4]  }
 0x1fe   :  { %451 = dma.done.wait [#allocation4], 256  }
 0x1ff   :  { %452 = vsyncadd [#allocation4], 4294967040 }
 0x200   :  { %313 = vsyncpa [#allocation3], 1 }
 0x201   :  { %314 = vsyncpa [#allocation6], 1 }
 0x202   :  { %315 = vsyncpa [#allocation4], 1 }

</bundles_post_ra>
